<compile_context>
chip_gen: v7x
topology: tpu7x:2x2x1
jax: 0.10.0
libtpu: 0.0.40
codegen_flags: <defaults>
</compile_context>

<pallas_src>
import jax
import jax.numpy as jnp
from jax.experimental import pallas as pl
from jax.experimental.pallas import tpu as pltpu


# ---------------------------------------------------------------------------
# Kernel: tiled identity copy (only used when a materialized output is needed)
# ---------------------------------------------------------------------------
def _copy_kernel(x_ref, o_ref):
    o_ref[...] = x_ref[...]


_LANE_WIDTH = 512   # lane-dense width: large multiple of 128 -> unmasked stores
_MAX_TILE_ROWS = 1024  # <= 2 MiB per f32 block; 4 live buffers fit v5e's 16 MiB


def _pallas_identity_copy(x):
    """Materialized identity copy, tiled for the HBM roofline."""
    orig_shape = x.shape
    n = x.size

    # Flatten to a lane-dense 2-D slab (rows, _LANE_WIDTH).
    flat = x.reshape(-1)
    pad = (-n) % _LANE_WIDTH
    if pad:
        flat = jnp.pad(flat, (0, pad))
    rows = flat.shape[0] // _LANE_WIDTH
    x2 = flat.reshape(rows, _LANE_WIDTH)

    # Row tile: full extent when small (always legal), otherwise a multiple
    # of 8 sublanes capped so the double-buffered pipeline fits scoped VMEM.
    if rows <= _MAX_TILE_ROWS:
        tile_r = rows
    else:
        tile_r = _MAX_TILE_ROWS
    grid = (pl.cdiv(rows, tile_r),)

    out = pl.pallas_call(
        _copy_kernel,
        out_shape=jax.ShapeDtypeStruct((rows, _LANE_WIDTH), x.dtype),
        grid_spec=pltpu.PrefetchScalarGridSpec(
            num_scalar_prefetch=0,
            grid=grid,
            in_specs=[pl.BlockSpec((tile_r, _LANE_WIDTH), lambda r: (r, 0))],
            out_specs=pl.BlockSpec((tile_r, _LANE_WIDTH), lambda r: (r, 0)),
        ),
        compiler_params=pltpu.CompilerParams(
            dimension_semantics=("parallel",),
        ),
    )(x2)

    out_flat = out.reshape(-1)
    if pad:
        out_flat = out_flat[:n]
    return out_flat.reshape(orig_shape)


# ---------------------------------------------------------------------------
# Forward wrapper (matches Coat_quantize_end.forward semantics exactly)
# ---------------------------------------------------------------------------
def coat_quantize_end_forward(input, Qinput, Iscale, *, group_size=16,
                              fp8type=jnp.float8_e4m3fn, materialize=False):
    """Forward of Coat_quantize_end: output == input (identity).

    Args:
      input:  (B, S, H) activation tensor (bf16 / f32).
      Qinput: (B, S, H) fp8 quantized activations (unused in forward).
      Iscale: (B, S, H // group_size) per-group scales (unused in forward).
      materialize: if True, produce a distinct output buffer via the tiled
        Pallas copy kernel; otherwise return `input` directly (no data
        movement — the optimal forward path).
    """
    del Qinput, Iscale, group_size, fp8type  # only needed for backward
    # TODO(synk): backward (fp8_quantize_pertensor of grad_output) is not part
    # of the forward spec and is not implemented here.
    if not materialize:
        return input
    return _pallas_identity_copy(input)


if __name__ == "__main__":
    key = jax.random.PRNGKey(0)
    B, S, H = 2, 8, 32
    group_size = 16

    k1, _ = jax.random.split(key)
    x = jax.random.normal(k1, (B, S, H), dtype=jnp.float32)

    # Synthetic quantized companions (deterministic, in-script):
    # per-group (1 x group_size) quantization along the hidden axis.
    xg = x.reshape(B, S, H // group_size, group_size)
    iscale = jnp.max(jnp.abs(xg), axis=-1) / 448.0 + 1e-8       # (B, S, H//group_size)
    qx = (xg / iscale[..., None]).reshape(B, S, H).astype(jnp.float8_e4m3fn)

    # Fast path (default): true identity, zero HBM traffic.
    out_fast = coat_quantize_end_forward(x, qx, iscale, group_size=group_size)
    out_fast = jax.block_until_ready(out_fast)
    assert out_fast.shape == x.shape and out_fast.dtype == x.dtype
    assert jnp.array_equal(out_fast, x)

    # Materialized path: exercises the tiled Pallas copy kernel once.
    out_copy = coat_quantize_end_forward(x, qx, iscale, group_size=group_size,
                                         materialize=True)
    out_copy = jax.block_until_ready(out_copy)
    assert out_copy.shape == x.shape and out_copy.dtype == x.dtype
    assert jnp.array_equal(out_copy, x)

    print("KERNEL_OK")
</pallas_src>

<mosaic_0001>
module attributes {stable_mosaic.version = 11 : i64} {
  func.func @_copy_kernel(%arg0: i32, %arg1: memref<1x512xf32, #tpu.memory_space<vmem>>, %arg2: memref<1x512xf32, #tpu.memory_space<vmem>>) attributes {dimension_semantics = [#tpu.dimension_semantics<parallel>], iteration_bounds = array<i64: 1>, scalar_prefetch = 0 : i64, scratch_operands = 0 : i64, tpu.core_type = #tpu.core_type<tc>, window_params = [{transform_indices = @transform_0, window_bounds = array<i64: 1, 512>}, {transform_indices = @transform_1, window_bounds = array<i64: 1, 512>}]} {
    %c0 = arith.constant 0 : index
    %c0_0 = arith.constant 0 : index
    %0 = vector.load %arg1[%c0, %c0_0] : memref<1x512xf32, #tpu.memory_space<vmem>>, vector<1x512xf32>
    %c0_1 = arith.constant 0 : index
    %c0_2 = arith.constant 0 : index
    %1 = vector.load %arg2[%c0_1, %c0_2] : memref<1x512xf32, #tpu.memory_space<vmem>>, vector<1x512xf32>
    tpu.vector_store %arg2[%c0_1, %c0_2], %0 {strides = array<i32>} : memref<1x512xf32, #tpu.memory_space<vmem>>, vector<1x512xf32>,
    return
  }
  func.func @transform_0(%arg0: i32) -> (i32, i32) {
    %c0_i32 = arith.constant 0 : i32
    %c0_i32_0 = arith.constant 0 : i32
    return %arg0, %c0_i32 : i32, i32
  }
  func.func @transform_1(%arg0: i32) -> (i32, i32) {
    %c0_i32 = arith.constant 0 : i32
    %c0_i32_0 = arith.constant 0 : i32
    return %arg0, %c0_i32 : i32, i32
  }
}

</mosaic_0001>

<bundles_post_ra>
// kernel: tpu_custom_call.1
= control target key start
LH: loop header
LB: loop body
LE: loop exit
PB: predicated region body
PF: predicated region fallthrough
CT: control target
= control target key end

     0   :  { %6 = vsyncpa [#allocation3], 0  ;;  %s128_s0 = inlined_call_operand.hbm [shape: f32[1,512], index: 0, kind: input, shape index: {}]   ;;  %s129_s1 = inlined_call_operand.hbm [shape: f32[1,512], index: 1, kind: output, shape index: {}]  }
   0x1   :  { %7 = vsyncpa [#allocation4], 0  ;;  %s92_s6 = smov [#allocation2]   ;;  %s44_s10 = scalar_lea.hbm %s128_s0, 64 }
   0x2   :  { %s14_s7 = sshll.u32 %s92_s6, 4  ;;  %p45_p0 = scmp.ne.s32.totalorder %s128_s0, %s44_s10  ;;  %s15_s7 = int_to_ptr.vmem [resolvable:$true] %s14_s7 }
   0x3   :  { %p48_p1 = scmp.lt.u32.totalorder %s44_s10, %s128_s0 }
   0x5   :  { %p50_p2 = pnand %p48_p1, %p45_p0 }
   0x7   :  { %53 = shalt.err (!%p50_p2)
}
   0x8   :  { %s54_s15 = scalar_lea.vmem %s15_s7, 64  ;;  %p59_p4 = scmp.lt.s32.totalorder %s15_s7, %s15_s7 }
   0x9   :  { %p55_p3 = scmp.ne.s32.totalorder %s15_s7, %s54_s15  ;;  %p60_p5 = scmp.lt.s32.totalorder %s54_s15, %s54_s15 }
   0xb   :  { %p61_p6 = por %p60_p5, %p59_p4 }
   0xd   :  { %p62_p7 = pnand %p61_p6, %p55_p3 }
   0xf   :  { %65 = shalt.err (!%p62_p7)
}
  0x10   :  { %17 = dma.hbm_to_vmem [thread:$0]  %s128_s0, 64, %s15_s7, [#allocation3]  }
  0x11   :  { %88 = dma.done.wait [#allocation3], 64  }
  0x12   :  { %89 = vsyncadd [#allocation3], 4294967232  ;;  %v22_v0 = vlaneseq  ;;  %s93_s18 = smov [#allocation5]   ;;  %v21_v1 = vld [vmem:[#allocation2] sm:$0xf] }
  0x13   :  { %s33_s19 = sshll.u32 %s93_s18, 4  ;;  %s34_s19 = int_to_ptr.vmem [resolvable:$true] %s33_s19 }
  0x14   :  { %vm24_vm0 = vcmp.lt.s32.totalorder %v22_v0, 512  ;;  %s66_s20 = scalar_lea.vmem %s34_s19, 64  ;;  %p71_p9 = scmp.lt.s32.totalorder %s34_s19, %s34_s19 }
  0x15   :  { %26 = vst.msk [vmem:[#allocation5] sm:$0xf] %vm24_vm0, %v21_v1  ;;  %p67_p8 = scmp.ne.s32.totalorder %s34_s19, %s66_s20  ;;  %p72_p10 = scmp.lt.s32.totalorder %s66_s20, %s66_s20 }
  0x17   :  { %p73_p11 = por %p72_p10, %p71_p9 }
  0x19   :  { %p74_p12 = pnand %p73_p11, %p67_p8 }
  0x1b   :  { %77 = shalt.err (!%p74_p12)
}
  0x1c   :  { %s78_s0 = scalar_lea.hbm %s129_s1, 64 }
  0x1d   :  { %p79_p13 = scmp.ne.s32.totalorder %s129_s1, %s78_s0  ;;  %p82_p0 = scmp.lt.u32.totalorder %s78_s0, %s129_s1 }
  0x1f   :  { %p84_p1 = pnand %p82_p0, %p79_p13 }
  0x21   :  { %87 = shalt.err (!%p84_p1)
}
  0x22   :  { %36 = dma.vmem_to_hbm [thread:$0]  %s34_s19, 64, %s129_s1, [#allocation4]  }
  0x23   :  { %90 = dma.done.wait [#allocation4], 64  }
  0x24   :  { %91 = vsyncadd [#allocation4], 4294967232 }
  0x25   :  { %40 = vsyncpa [#allocation3], 1 }
  0x26   :  { %41 = vsyncpa [#allocation4], 1 }

</bundles_post_ra>
